<compile_context>
chip_gen: v7x
topology: tpu7x:2x2x1
jax: 0.10.0
libtpu: 0.0.40
codegen_flags: <defaults>
</compile_context>

<pallas_src>
import jax
import jax.numpy as jnp
from jax import lax
from jax.experimental import pallas as pl
from jax.experimental.pallas import tpu as pltpu


def _round_up(x: int, m: int) -> int:
    return ((x + m - 1) // m) * m


def _pick_tile(limit: int, total_padded: int, quantum: int) -> int:
    """Largest multiple of `quantum` <= limit that divides total_padded (a multiple
    of quantum) -- avoids tiles that are mostly padding."""
    limit = max(quantum, (min(limit, total_padded) // quantum) * quantum)
    for cand in range(limit, quantum - 1, -quantum):
        if total_padded % cand == 0:
            return cand
    return quantum


def _auto_compute_dtype():
    """bf16 on chips with native bf16 VPU/EUP (v6e/v7x+), f32 on v5e and older."""
    try:
        kind = jax.devices()[0].device_kind.lower()
    except Exception:
        return jnp.float32
    if any(g in kind for g in ("v2", "v3", "v4", "v5")):
        return jnp.float32
    return jnp.bfloat16


def _concat_attn_kernel(s_any_ref, t_any_ref,          # SMEM scalar-prefetch flags
                        vmat_ref, a_ref, b_ref, sbias_ref, tbias_ref,
                        out_ref):
    """One grid step = one (S-tile, batch, T-tile) output block.

    s_any_ref: (B, nS) i32 SMEM  -- 1 iff any source position kept in that S tile
    t_any_ref: (B, nT) i32 SMEM  -- 1 iff any target position kept in that T tile
    vmat_ref:  (rc, rc*H)        -- block-diag replication of v (constant, small)
    a_ref:     (1, H, tS)        -- source projection, H on sublanes (compute dtype)
    b_ref:     (1, tT, H)        -- target projection (compute dtype)
    sbias_ref: (1, 1, tS)  f32   -- 0 / -inf additive source-mask bias
    tbias_ref: (1, tT, 1)  f32   -- 0 / -inf additive target-mask bias
    out_ref:   (1, tT, tS)
    """
    si = pl.program_id(0)
    bi = pl.program_id(1)
    ti = pl.program_id(2)
    active = jnp.logical_and(s_any_ref[bi, si] != 0, t_any_ref[bi, ti] != 0)

    rc = vmat_ref.shape[0]          # row chunk (multiple of 8, divides tT)
    tT = out_ref.shape[1]
    n_chunks = tT // rc

    @pl.when(active)
    def _compute():
        a = a_ref[0]                 # (H, tS)    -- loaded once per tile
        sb = sbias_ref[0]            # (1, tS) f32
        vmat = vmat_ref[...]         # (rc, rc*H) mxu dtype

        def body(r, carry):
            start = pl.multiple_of(r * rc, rc)
            bchunk = b_ref[0, pl.ds(start, rc), :]                    # (rc, H)
            # tanh(concat @ W) == tanh(src@Ws + tgt@Wt); only a (rc, H, tS) slab is
            # live at a time so it stays (mostly) in vregs instead of VMEM.
            h = jnp.tanh(bchunk[:, :, None] + a[None, :, :])          # (rc, H, tS)
            h2 = h.reshape(rc * a.shape[0], a.shape[1]).astype(vmat.dtype)
            sc = jnp.dot(vmat, h2, preferred_element_type=jnp.float32)  # (rc, tS) MXU
            sc = sc + sb + tbias_ref[0, pl.ds(start, rc), :]          # f32 bias add
            out_ref[0, pl.ds(start, rc), :] = sc.astype(out_ref.dtype)
            return carry

        lax.fori_loop(0, n_chunks, body, 0)

    @pl.when(jnp.logical_not(active))
    def _skip():
        # Fully masked (or fully padded) tile: skip the tanh, store -inf directly.
        out_ref[...] = jnp.full(out_ref.shape, -jnp.inf, dtype=out_ref.dtype)


def concat_attention(source_vectors, target_vectors, W, v,
                     source_mask=None, target_mask=None,
                     *, block_t: int = 32, block_s: int = 512, row_chunk: int = 8,
                     compute_dtype=None, mxu_dtype=None,
                     out_dtype=jnp.float32,
                     vmem_limit_bytes=None):
    """Pallas wrapper mirroring ConcatAttention.forward.

    source_vectors: (B, S, E_s)
    target_vectors: (B, T, E_t) or (B, E_t) (single target vector)
    W:              (E_s + E_t, H)   (concat order: [source, target])
    v:              (H,)
    source_mask:    optional bool (B, S)
    target_mask:    optional bool (B, T)
    compute_dtype:  dtype of the tanh intermediate. None -> auto (bf16 on v6e/v7x,
                    f32 on v5e and older).
    mxu_dtype:      dtype of the v-contraction operands. None -> compute_dtype.
                    On v5e, compute_dtype=f32 + mxu_dtype=bf16 avoids f32 MXU
                    emulation at negligible numerical cost (tanh output in [-1,1]).
    out_dtype:      dtype of the returned scores (f32 default; bf16 halves the
                    mandatory HBM writeback if downstream softmax tolerates it).
    returns:        (B, T, S)  (or (B, S) if target was a single vector)
    """
    if compute_dtype is None:
        compute_dtype = _auto_compute_dtype()
    if mxu_dtype is None:
        mxu_dtype = compute_dtype

    target_is_single_vector = target_vectors.ndim == 2
    if target_is_single_vector:
        if target_mask is not None:
            raise ValueError("target_mask is not valid when target is a single vector")
        target_vectors = target_vectors[:, None, :]

    B, S, E_s = source_vectors.shape
    _, T, E_t = target_vectors.shape
    H = W.shape[1]
    assert W.shape[0] == E_s + E_t

    src = source_vectors.astype(jnp.float32)
    tgt = target_vectors.astype(jnp.float32)
    Ws = W[:E_s].astype(jnp.float32)                 # multiplies source features
    Wt = W[E_s:].astype(jnp.float32)                 # multiplies target features
    v32 = v.astype(jnp.float32)

    # ---- Hoisted projections: one batched GEMM each (better MXU use than tiny
    # (tS,E)x(E,H) matmuls inside the kernel). ----
    a_proj = jnp.einsum("bse,eh->bhs", src, Ws)      # (B, H, S)  transposed layout
    b_proj = jnp.einsum("bte,eh->bth", tgt, Wt)      # (B, T, H)

    # ---- Padding-aware tile sizes: lane-dense S tiles (mult of 128) that divide
    # round_up(S, 128); sublane-aligned T tiles that divide round_up(T, 8). ----
    S_pad = _round_up(S, 128)
    T_pad = _round_up(T, 8)
    tS = _pick_tile(_round_up(block_s, 128), S_pad, 128)
    tT = _pick_tile(_round_up(block_t, 8), T_pad, 8)
    nS = S_pad // tS
    nT = T_pad // tT

    # Row chunk: multiple of 8 that divides tT (8 always works since tT % 8 == 0).
    rc = max(8, (min(row_chunk, tT) // 8) * 8)
    if tT % rc != 0:
        rc = 8

    a_proj = jnp.pad(a_proj, ((0, 0), (0, 0), (0, S_pad - S))).astype(compute_dtype)
    b_proj = jnp.pad(b_proj, ((0, 0), (0, T_pad - T), (0, 0))).astype(compute_dtype)

    # ---- Masks -> additive 0 / -inf biases + per-tile "any kept" SMEM flags. ----
    keep_s = jnp.ones((B, S), dtype=bool) if source_mask is None else source_mask.astype(bool)
    keep_t = jnp.ones((B, T), dtype=bool) if target_mask is None else target_mask.astype(bool)
    keep_s = jnp.pad(keep_s, ((0, 0), (0, S_pad - S)), constant_values=False)
    keep_t = jnp.pad(keep_t, ((0, 0), (0, T_pad - T)), constant_values=False)

    sbias = jnp.where(keep_s, 0.0, -jnp.inf).astype(jnp.float32)[:, None, :]   # (B, 1, S_pad)
    tbias = jnp.where(keep_t, 0.0, -jnp.inf).astype(jnp.float32)[:, :, None]   # (B, T_pad, 1)
    s_any = keep_s.reshape(B, nS, tS).any(axis=-1).astype(jnp.int32)           # (B, nS)
    t_any = keep_t.reshape(B, nT, tT).any(axis=-1).astype(jnp.int32)           # (B, nT)

    # Small block-diagonal replication of v (rc x waste only, independent of tT):
    # (rc, rc*H) @ (rc*H, tS) == per-row (1,H)@(H,tS) contraction with v.
    vmat = jnp.kron(jnp.eye(rc, dtype=jnp.float32), v32[None, :]).astype(mxu_dtype)

    # ---- VMEM budget derived from the actual block sizes (fits v7x's 64 MiB). ----
    if vmem_limit_bytes is None:
        cb = jnp.dtype(compute_dtype).itemsize
        mb = jnp.dtype(mxu_dtype).itemsize
        ob = jnp.dtype(out_dtype).itemsize
        block_bytes = (2 * H * tS * cb            # a_proj (double-buffered)
                       + 2 * tT * H * cb          # b_proj
                       + 2 * 8 * tS * 4           # sbias (sublane-padded)
                       + 2 * tT * 128 * 4         # tbias (lane-padded)
                       + 2 * tT * tS * ob         # out
                       + 2 * rc * rc * H * mb)    # vmat
        interm_bytes = 2 * rc * H * tS * max(cb, 4)
        vmem_limit_bytes = min(64 * 1024 * 1024,
                               max(32 * 1024 * 1024, 4 * (block_bytes + interm_bytes)))

    # Grid: largest parallel axis (nS) leads (v7x megacore), T-tile innermost so the
    # big a_proj block is fetched once per (S-tile, batch) and only the small b_proj
    # block changes per step.
    grid = (nS, B, nT)

    out = pl.pallas_call(
        _concat_attn_kernel,
        out_shape=jax.ShapeDtypeStruct((B, T_pad, S_pad), out_dtype),
        grid_spec=pltpu.PrefetchScalarGridSpec(
            num_scalar_prefetch=2,
            grid=grid,
            in_specs=[
                pl.BlockSpec((rc, rc * H), lambda si, b, ti, sa, ta: (0, 0)),      # vmat
                pl.BlockSpec((1, H, tS),   lambda si, b, ti, sa, ta: (b, 0, si)),  # a_proj
                pl.BlockSpec((1, tT, H),   lambda si, b, ti, sa, ta: (b, ti, 0)),  # b_proj
                pl.BlockSpec((1, 1, tS),   lambda si, b, ti, sa, ta: (b, 0, si)),  # sbias
                pl.BlockSpec((1, tT, 1),   lambda si, b, ti, sa, ta: (b, ti, 0)),  # tbias
            ],
            out_specs=pl.BlockSpec((1, tT, tS), lambda si, b, ti, sa, ta: (b, ti, si)),
        ),
        compiler_params=pltpu.CompilerParams(
            dimension_semantics=("parallel", "parallel", "parallel"),
            vmem_limit_bytes=int(vmem_limit_bytes),
        ),
    )(s_any, t_any, vmat, a_proj, b_proj, sbias, tbias)

    out = out[:, :T, :S]
    if target_is_single_vector:
        out = out[:, 0, :]
    return out


def _reference(source_vectors, target_vectors, W, v, source_mask=None, target_mask=None):
    """Pure-JAX reference of the intended forward, for validation."""
    single = target_vectors.ndim == 2
    if single:
        target_vectors = target_vectors[:, None, :]
    B, S, E_s = source_vectors.shape
    _, T, E_t = target_vectors.shape
    src = jnp.broadcast_to(source_vectors[:, None, :, :], (B, T, S, E_s))
    tgt = jnp.broadcast_to(target_vectors[:, :, None, :], (B, T, S, E_t))
    concat = jnp.concatenate([src, tgt], axis=3)
    scores = jnp.tanh(concat @ W) @ v                          # (B, T, S)
    if source_mask is not None:
        scores = jnp.where(source_mask[:, None, :], scores, -jnp.inf)
    if target_mask is not None:
        scores = jnp.where(target_mask[:, :, None], scores, -jnp.inf)
    if single:
        scores = scores[:, 0, :]
    return scores


if __name__ == "__main__":
    key = jax.random.PRNGKey(0)
    k_src, k_tgt, k_W, k_v, k_sm, k_tm = jax.random.split(key, 6)

    # Small shapes consistent with the module.
    B, S, T = 2, 16, 8
    E_s, E_t, H = 8, 8, 32

    source_vectors = jax.random.normal(k_src, (B, S, E_s), dtype=jnp.float32)
    target_vectors = jax.random.normal(k_tgt, (B, T, E_t), dtype=jnp.float32)

    bound_W = (6.0 / (E_s + E_t + H)) ** 0.5
    W = jax.random.uniform(k_W, (E_s + E_t, H), minval=-bound_W, maxval=bound_W,
                           dtype=jnp.float32)
    # TODO(synk): torch xavier_uniform_ on a 1-D tensor is ill-defined (it errors);
    # use a uniform init with a comparable bound for v.
    bound_v = (6.0 / (H + 1)) ** 0.5
    v = jax.random.uniform(k_v, (H,), minval=-bound_v, maxval=bound_v, dtype=jnp.float32)

    source_mask = jax.random.uniform(k_sm, (B, S)) > 0.3
    target_mask = jax.random.uniform(k_tm, (B, T)) > 0.3

    # 1) no masks, exact f32 compute path.
    out = jax.block_until_ready(
        concat_attention(source_vectors, target_vectors, W, v,
                         compute_dtype=jnp.float32))
    ref = _reference(source_vectors, target_vectors, W, v)
    assert out.shape == (B, T, S)
    assert jnp.allclose(out, ref, atol=1e-4, rtol=1e-4)

    # 2) with masks (exercises the additive -inf bias path), f32.
    out_m = jax.block_until_ready(
        concat_attention(source_vectors, target_vectors, W, v,
                         source_mask=source_mask, target_mask=target_mask,
                         compute_dtype=jnp.float32))
    ref_m = _reference(source_vectors, target_vectors, W, v,
                       source_mask=source_mask, target_mask=target_mask)
    finite = jnp.isfinite(ref_m)
    assert bool(jnp.all(jnp.isfinite(out_m) == finite))
    assert jnp.allclose(jnp.where(finite, out_m, 0.0), jnp.where(finite, ref_m, 0.0),
                        atol=1e-4, rtol=1e-4)

    # 3) single target-vector path, f32.
    out_s = jax.block_until_ready(
        concat_attention(source_vectors, target_vectors[:, 0, :], W, v,
                         compute_dtype=jnp.float32))
    assert out_s.shape == (B, S)
    assert jnp.allclose(out_s, ref[:, 0, :], atol=1e-4, rtol=1e-4)

    # 4) multi-tile grid + T/S padding + fully-masked-tile skip path, f32.
    S2, T2 = 200, 20
    ks1, ks2, ks3 = jax.random.split(k_sm, 3)
    src2 = jax.random.normal(ks1, (B, S2, E_s), dtype=jnp.float32)
    tgt2 = jax.random.normal(ks2, (B, T2, E_t), dtype=jnp.float32)
    smask2 = jax.random.uniform(ks3, (B, S2)) > 0.2
    tmask2 = jnp.ones((B, T2), dtype=bool).at[:, 8:16].set(False)  # whole middle T-tile masked
    out2 = jax.block_until_ready(
        concat_attention(src2, tgt2, W, v, source_mask=smask2, target_mask=tmask2,
                         block_t=8, block_s=128, compute_dtype=jnp.float32))
    ref2 = _reference(src2, tgt2, W, v, source_mask=smask2, target_mask=tmask2)
    finite2 = jnp.isfinite(ref2)
    assert out2.shape == (B, T2, S2)
    assert bool(jnp.all(jnp.isfinite(out2) == finite2))
    assert jnp.allclose(jnp.where(finite2, out2, 0.0), jnp.where(finite2, ref2, 0.0),
                        atol=1e-4, rtol=1e-4)

    # 5) auto compute_dtype (bf16 on v6e/v7x, f32 on v5e) -- loose tolerance.
    out_auto = jax.block_until_ready(concat_attention(source_vectors, target_vectors, W, v))
    assert jnp.allclose(out_auto, ref, atol=0.25)

    # 6) v5e-style path: f32 tanh + bf16 MXU operands -- loose-ish tolerance.
    out_mxu = jax.block_until_ready(
        concat_attention(source_vectors, target_vectors, W, v,
                         compute_dtype=jnp.float32, mxu_dtype=jnp.bfloat16))
    assert jnp.allclose(out_mxu, ref, atol=0.1)

    print("KERNEL_OK")
</pallas_src>

<mosaic_0001>
module attributes {stable_mosaic.version = 11 : i64} {
  func.func @_concat_attn_kernel(%arg0: i32, %arg1: i32, %arg2: i32, %arg3: memref<2x1xi32, #tpu.memory_space<smem>>, %arg4: memref<2x1xi32, #tpu.memory_space<smem>>, %arg5: memref<8x256xf32, #tpu.memory_space<vmem>>, %arg6: memref<1x32x128xf32, #tpu.memory_space<vmem>>, %arg7: memref<1x8x32xf32, #tpu.memory_space<vmem>>, %arg8: memref<1x1x128xf32, #tpu.memory_space<vmem>>, %arg9: memref<1x8x1xf32, #tpu.memory_space<vmem>>, %arg10: memref<1x8x128xf32, #tpu.memory_space<vmem>>) attributes {dimension_semantics = [#tpu.dimension_semantics<parallel>, #tpu.dimension_semantics<parallel>, #tpu.dimension_semantics<parallel>], iteration_bounds = array<i64: 1, 2, 1>, scalar_prefetch = 2 : i64, scratch_operands = 0 : i64, tpu.core_type = #tpu.core_type<tc>, window_params = [{pipeline_mode = #tpu.pipeline_mode<synchronous>, transform_indices = @transform_0, window_bounds = array<i64: 8, 256>}, {transform_indices = @transform_1, window_bounds = array<i64: 1, 32, 128>}, {transform_indices = @transform_2, window_bounds = array<i64: 1, 8, 32>}, {transform_indices = @transform_3, window_bounds = array<i64: 1, 1, 128>}, {transform_indices = @transform_4, window_bounds = array<i64: 1, 8, 1>}, {transform_indices = @transform_5, window_bounds = array<i64: 1, 8, 128>}]} {
    %0 = arith.index_cast %arg1 : i32 to index
    %1 = arith.index_cast %arg0 : i32 to index
    %2 = memref.load %arg3[%0, %1] : memref<2x1xi32, #tpu.memory_space<smem>>
    %c0_i32 = arith.constant 0 : i32
    %3 = arith.cmpi ne, %2, %c0_i32 : i32
    %4 = arith.index_cast %arg1 : i32 to index
    %5 = arith.index_cast %arg2 : i32 to index
    %6 = memref.load %arg4[%4, %5] : memref<2x1xi32, #tpu.memory_space<smem>>
    %c0_i32_0 = arith.constant 0 : i32
    %7 = arith.cmpi ne, %6, %c0_i32_0 : i32
    %8 = arith.andi %3, %7 : i1
    %9 = arith.extui %8 : i1 to i32
    %c0_i32_1 = arith.constant 0 : i32
    %10 = arith.cmpi ne, %9, %c0_i32_1 : i32
    scf.if %10 {
      %c0 = arith.constant 0 : index
      %c0_3 = arith.constant 0 : index
      %c0_4 = arith.constant 0 : index
      %14 = vector.load %arg6[%c0, %c0_3, %c0_4] : memref<1x32x128xf32, #tpu.memory_space<vmem>>, vector<1x32x128xf32>
      %15 = vector.shape_cast %14 : vector<1x32x128xf32> to vector<32x128xf32>
      %c0_5 = arith.constant 0 : index
      %c0_6 = arith.constant 0 : index
      %c0_7 = arith.constant 0 : index
      %16 = vector.load %arg8[%c0_5, %c0_6, %c0_7] : memref<1x1x128xf32, #tpu.memory_space<vmem>>, vector<1x1x128xf32>
      %17 = vector.shape_cast %16 : vector<1x1x128xf32> to vector<1x128xf32>
      %c0_8 = arith.constant 0 : index
      %c0_9 = arith.constant 0 : index
      %18 = vector.load %arg5[%c0_8, %c0_9] : memref<8x256xf32, #tpu.memory_space<vmem>>, vector<8x256xf32>
      %c0_i32_10 = arith.constant 0 : i32
      %c8_i32 = arith.constant 8 : i32
      %19 = arith.muli %c0_i32_10, %c8_i32 : i32
      %20 = tpu.assume_multiple %19, 8 : i32
      %c0_11 = arith.constant 0 : index
      %21 = arith.index_cast %20 : i32 to index
      %c0_12 = arith.constant 0 : index
      %22 = vector.load %arg7[%c0_11, %21, %c0_12] : memref<1x8x32xf32, #tpu.memory_space<vmem>>, vector<1x8x32xf32>
      %23 = vector.shape_cast %22 : vector<1x8x32xf32> to vector<8x32xf32>
      %24 = vector.shape_cast %23 : vector<8x32xf32> to vector<8x32x1xf32>
      %25 = vector.shape_cast %15 : vector<32x128xf32> to vector<1x32x128xf32>
      %26 = vector.broadcast %24 : vector<8x32x1xf32> to vector<8x32x128xf32>
      %27 = vector.broadcast %25 : vector<1x32x128xf32> to vector<8x32x128xf32>
      %28 = arith.addf %26, %27 : vector<8x32x128xf32>
      %29 = math.tanh %28 : vector<8x32x128xf32>
      %30 = vector.shape_cast %29 : vector<8x32x128xf32> to vector<256x128xf32>
      %cst = arith.constant dense<0.000000e+00> : vector<8x128xf32>
      %31 = tpu.matmul %18, %30, %cst {dimension_numbers = #tpu.dot_dimension_numbers<[1], [0], [0], [1], [0, 0, 1, 1], [], []>} : vector<8x256xf32>, vector<256x128xf32>, vector<8x128xf32> -> vector<8x128xf32>
      %32 = vector.broadcast %17 : vector<1x128xf32> to vector<8x128xf32>
      %33 = arith.addf %31, %32 : vector<8x128xf32>
      %c0_13 = arith.constant 0 : index
      %34 = arith.index_cast %20 : i32 to index
      %c0_14 = arith.constant 0 : index
      %35 = vector.load %arg9[%c0_13, %34, %c0_14] : memref<1x8x1xf32, #tpu.memory_space<vmem>>, vector<1x8x1xf32>
      %36 = vector.shape_cast %35 : vector<1x8x1xf32> to vector<8x1xf32>
      %37 = vector.broadcast %36 : vector<8x1xf32> to vector<8x128xf32>
      %38 = arith.addf %33, %37 : vector<8x128xf32>
      %c0_15 = arith.constant 0 : index
      %39 = arith.index_cast %20 : i32 to index
      %c0_16 = arith.constant 0 : index
      %40 = vector.load %arg10[%c0_15, %39, %c0_16] : memref<1x8x128xf32, #tpu.memory_space<vmem>>, vector<1x8x128xf32>
      %41 = vector.shape_cast %40 : vector<1x8x128xf32> to vector<8x128xf32>
      %42 = vector.shape_cast %38 : vector<8x128xf32> to vector<1x8x128xf32>
      tpu.vector_store %arg10[%c0_15, %39, %c0_16], %42 {strides = array<i32>} : memref<1x8x128xf32, #tpu.memory_space<vmem>>, vector<1x8x128xf32>,
      %c1_i32 = arith.constant 1 : i32
    } else {
    }
    %true = arith.constant true
    %11 = arith.xori %8, %true : i1
    %12 = arith.extui %11 : i1 to i32
    %c0_i32_2 = arith.constant 0 : i32
    %13 = arith.cmpi ne, %12, %c0_i32_2 : i32
    scf.if %13 {
      %cst = arith.constant 0xFF800000 : f32
      %14 = vector.broadcast %cst : f32 to vector<1x8x128xf32>
      %c0 = arith.constant 0 : index
      %c0_3 = arith.constant 0 : index
      %c0_4 = arith.constant 0 : index
      %15 = vector.load %arg10[%c0, %c0_3, %c0_4] : memref<1x8x128xf32, #tpu.memory_space<vmem>>, vector<1x8x128xf32>
      tpu.vector_store %arg10[%c0, %c0_3, %c0_4], %14 {strides = array<i32>} : memref<1x8x128xf32, #tpu.memory_space<vmem>>, vector<1x8x128xf32>,
    } else {
    }
    return
  }
  func.func @transform_0(%arg0: i32, %arg1: i32, %arg2: i32, %arg3: memref<2x1xi32, #tpu.memory_space<smem>>, %arg4: memref<2x1xi32, #tpu.memory_space<smem>>) -> (i32, i32) {
    %c0_i32 = arith.constant 0 : i32
    %c0_i32_0 = arith.constant 0 : i32
    %c0_i32_1 = arith.constant 0 : i32
    return %c0_i32, %c0_i32_0 : i32, i32
  }
  func.func @transform_1(%arg0: i32, %arg1: i32, %arg2: i32, %arg3: memref<2x1xi32, #tpu.memory_space<smem>>, %arg4: memref<2x1xi32, #tpu.memory_space<smem>>) -> (i32, i32, i32) {
    %c0_i32 = arith.constant 0 : i32
    %c0_i32_0 = arith.constant 0 : i32
    return %arg1, %c0_i32, %arg0 : i32, i32, i32
  }
  func.func @transform_2(%arg0: i32, %arg1: i32, %arg2: i32, %arg3: memref<2x1xi32, #tpu.memory_space<smem>>, %arg4: memref<2x1xi32, #tpu.memory_space<smem>>) -> (i32, i32, i32) {
    %c0_i32 = arith.constant 0 : i32
    %c0_i32_0 = arith.constant 0 : i32
    return %arg1, %arg2, %c0_i32 : i32, i32, i32
  }
  func.func @transform_3(%arg0: i32, %arg1: i32, %arg2: i32, %arg3: memref<2x1xi32, #tpu.memory_space<smem>>, %arg4: memref<2x1xi32, #tpu.memory_space<smem>>) -> (i32, i32, i32) {
    %c0_i32 = arith.constant 0 : i32
    %c0_i32_0 = arith.constant 0 : i32
    return %arg1, %c0_i32, %arg0 : i32, i32, i32
  }
  func.func @transform_4(%arg0: i32, %arg1: i32, %arg2: i32, %arg3: memref<2x1xi32, #tpu.memory_space<smem>>, %arg4: memref<2x1xi32, #tpu.memory_space<smem>>) -> (i32, i32, i32) {
    %c0_i32 = arith.constant 0 : i32
    %c0_i32_0 = arith.constant 0 : i32
    return %arg1, %arg2, %c0_i32 : i32, i32, i32
  }
  func.func @transform_5(%arg0: i32, %arg1: i32, %arg2: i32, %arg3: memref<2x1xi32, #tpu.memory_space<smem>>, %arg4: memref<2x1xi32, #tpu.memory_space<smem>>) -> (i32, i32, i32) {
    %c0_i32 = arith.constant 0 : i32
    return %arg1, %arg2, %arg0 : i32, i32, i32
  }
}

</mosaic_0001>

<bundles_post_ra>
// kernel: tpu_custom_call.1
= control target key start
LH: loop header
LB: loop body
LE: loop exit
PB: predicated region body
PF: predicated region fallthrough
CT: control target
= control target key end

     0   :  { %s1514_s0 = inlined_call_operand.vmem [shape: s32[2,1], index: 0, kind: input, shape index: {}]   ;;  %s1515_s2 = inlined_call_operand.vmem [shape: f32[8,256], index: 2, kind: input, shape index: {}]   ;;  %s1516_s3 = inlined_call_operand.hbm [shape: f32[2,32,128], index: 3, kind: input, shape index: {}]   ;;  %s1517_s4 = inlined_call_operand.vmem [shape: f32[2,8,32], index: 4, kind: input, shape index: {}]   ;;  %s1518_s5 = inlined_call_operand.vmem [shape: f32[2,1,128], index: 5, kind: input, shape index: {}]   ;;  %s1519_s6 = inlined_call_operand.vmem [shape: f32[2,8,1], index: 6, kind: input, shape index: {}]   ;;  %s1520_s7 = inlined_call_operand.hbm [shape: f32[2,8,128], index: 7, kind: output, shape index: {}]   ;;  %s1521_s1 = inlined_call_operand.vmem [shape: s32[2,1], index: 1, kind: input, shape index: {}]  }
   0x1   :  { %1525 = sst [smem:[#allocation14_spill]] %s1516_s3  ;;  %s12_s26 = sshll.u32 %s1514_s0, 4  ;;  %s13_s26 = int_to_ptr.vmem [resolvable:$true] %s12_s26 }
   0x2   :  { %s16_s29 = sshll.u32 %s1521_s1, 4  ;;  %s1059_s30 = scalar_lea.vmem %s13_s26, 32  ;;  %s17_s29 = int_to_ptr.vmem [resolvable:$true] %s16_s29 }
   0x3   :  { %p1060_p0 = scmp.ne.s32.totalorder %s13_s26, %s1059_s30  ;;  %p1064_p1 = scmp.lt.s32.totalorder %s13_s26, %s13_s26 }
   0x4   :  { %p1065_p2 = scmp.lt.s32.totalorder %s1059_s30, %s1059_s30 }
   0x6   :  { %p1066_p3 = por %p1065_p2, %p1064_p1 }
   0x8   :  { %p1067_p4 = pnand %p1066_p3, %p1060_p0 }
   0xa   :  { %1070 = shalt.err (!%p1067_p4)  }
   0xb   :  { %s1199_s8 = smov [#allocation3]   ;;  %s1071_s9 = scalar_lea.vmem %s17_s29, 32 }
   0xc   :  { %15 = dma.vmem_to_smem %s13_s26, 32, %s1199_s8, [#allocation2] }
   0xd   :  { %p1072_p5 = scmp.ne.s32.totalorder %s17_s29, %s1071_s9  ;;  %p1076_p6 = scmp.lt.s32.totalorder %s17_s29, %s17_s29 }
   0xe   :  { %p1077_p7 = scmp.lt.s32.totalorder %s1071_s9, %s1071_s9 }
  0x10   :  { %p1078_p8 = por %p1077_p7, %p1076_p6 }
  0x12   :  { %p1079_p9 = pnand %p1078_p8, %p1072_p5 }
  0x14   :  { %1082 = shalt.err (!%p1079_p9)  }
  0x15   :  { %s1200_s0 = smov [#allocation4]  }
  0x16   :  { %19 = dma.vmem_to_smem %s17_s29, 32, %s1200_s0, [#allocation2] }
  0x17   :  { %1165 = dma.done.wait [#allocation2], 64 }
  0x18   :  { %1166 = vsyncadd [#allocation2], 4294967232 }
  0x19   :  { %21 = sfence }
  0x1a   :  { %22 = vsyncpa [#allocation6], 0 }
  0x1b   :  { %24 = vsyncpa [#allocation6 + $0x1], 0 }
  0x1c   :  { %25 = vsyncpa [#allocation7], 0 }
  0x1d   :  { %27 = vsyncpa [#allocation7 + $0x1], 0  ;;  %s1253_s1 = smov 0   ;;  %s1255_s10 = smov 0  }
  0x1e   :  { %s1257_s11 = smov 0   ;;  %s1259_s12 = smov 0  }
  0x1f   :  { %s1261_s13 = smov 0   ;;  %s1263_s14 = smov 0  }
  0x20 LB: > { %1526 = sst [smem:[#allocation12_spill]] %s1193_s13  ;;  %s839_s15 = sadd.s32 4294967295, %s1197_s14   ;;  %s1197_s14 = sphi %s1263_s14, %s33_s14   ;;  %s1193_s13 = sphi %s1261_s13, %s1540_s13   ;;  %s1189_s12 = sphi %s1259_s12, %s1539_s12   ;;  %s1185_s11 = sphi %s1257_s11, %s1543_s11   ;;  %s1181_s10 = sphi %s1255_s10, %s1542_s10   ;;  %s1177_s1 = sphi %s1253_s1, %s1541_s1  }
  0x21   : > { %s840_s16 = sadd.s32 4294967294, %s1197_s14   ;;  %s48_s17 = sadd.s32 1, %s1193_s13 }
  0x22   : > { %s82_s18 = sadd.s32 1, %s1185_s11  ;;  %p50_p10 = scmp.ge.s32.totalorder %s48_s17, 2 }
  0x23   : > { %p89_p11 = scmp.ne.s32.totalorder %s1185_s11, %s1181_s10  ;;  %p90_p12 = scmp.eq.s32.totalorder %s1197_s14, 0 }
  0x24   : > { %p95_p13 = scmp.ne.s32.totalorder %s1181_s10, %s1177_s1  ;;  %s1545_s17 = smov (%p50_p10, %s48_s17), 0 }
  0x25   : > { %1527 = sst [smem:[#allocation13_spill]] %s1545_s17  ;;  %p1294_p0 = por %p90_p12, %p89_p11 }
  0x26   : > { %p96_p1 = scmp.eq.s32.totalorder %s839_s15, 0  ;;  %s77_s20 = ssub.s32 %s1193_s13, %s1545_s17 }
  0x27   : > { %p207_p2 = scmp.eq.s32.totalorder %s839_s15, 1  ;;  %p80_p3 = scmp.eq.s32.totalorder %s77_s20, 0 }
  0x28   : > { %p1300_p4 = por %p96_p1, %p95_p13  ;;  %p213_p6 = scmp.eq.s32.totalorder %s840_s16, 1 }
  0x29   : > { %p1304_p5 = por %p207_p2, %p89_p11  ;;  %p938_p9 = scmp.lt.s32.totalorder %s1197_s14, 2 }
  0x2a   : > { %s1309_s23 = scalar_select %p80_p3, %s1185_s11, %s82_s18  }
  0x2b   : > { %s1530_s22 = scalar_select %p1304_p5, 1, 0 }
  0x2c   : > { %p1311_p7 = por %p213_p6, %p95_p13  ;;  %s236_s25 = sand.u32 1, %s1185_s11  }
  0x2d   : > { %s843_s26 = sshll.u32 %s236_s25, 5  ;;  %s858_s27 = sshll.u32 %s1193_s13, 9 }
  0x2e   : > { %s1531_s24 = scalar_select %p1311_p7, 1, 0 }
  0x2f   : > { %s1532_s3 = sld [smem:[#allocation14_spill]]  ;;  %s240_s8 = scalar_lea.vmem [#allocation5], %s843_s26 }
  0x30   : > { %s248_s9 = sshll.u32 %s240_s8, 4  ;;  %p1328_p10 = pnand %p938_p9, %p1294_p0  ;;  %s1324_s9 = int_to_ptr.vmem [resolvable:$true] %s248_s9 }
  0x31   : > { %s1333_s15 = scalar_lea.sflag [#allocation6], %s236_s25 }
  0x32   : > { %p1085_p13 = pneg %p1328_p10 }
  0x35   : > { %s1322_s30 = scalar_lea.hbm %s1532_s3, %s858_s27  ;;  %s1088_s19 = scalar_lea.hbm %s1532_s3, 1024 }
  0x36   : > { %s1083_s16 = scalar_lea.hbm %s1322_s30, 512  ;;  %p1089_p0 = scmp.lt.u32.totalorder %s1322_s30, %s1532_s3 }
  0x37   : > { %p1084_p12 = scmp.ne.s32.totalorder %s1322_s30, %s1083_s16  ;;  %p1090_p3 = scmp.lt.u32.totalorder %s1088_s19, %s1083_s16 }
  0x38   : > { %p1092_p9 = scmp.lt.u32.totalorder %s1083_s16, %s1322_s30 }
  0x39   : > { %p1086_p1 = pnand %p1085_p13, %p1084_p12  ;;  %p1091_p6 = por %p1090_p3, %p1089_p0 }
  0x3b   : > { %p1087_p2 = pneg %p1086_p1  ;;  %p1093_p8 = por %p1092_p9, %p1091_p6 }
  0x3d   : > { %p1094_p11 = pnand %p1093_p8, %p1087_p2 }
  0x3f   : > { %1097 = shalt.err (!%p1094_p11)
}
  0x40   : > { %s1098_s25 = scalar_lea.vmem %s1324_s9, 512  ;;  %s1201_s28 = smov [#allocation5]  }
  0x41   : > { %p1099_p12 = scmp.ne.s32.totalorder %s1324_s9, %s1098_s25  ;;  %s1103_s29 = sshll.u32 %s1201_s28, 4  ;;  %s1104_s29 = int_to_ptr.vmem [resolvable:$false] %s1103_s29 }
  0x42   : > { %s1105_s8 = scalar_lea.vmem %s1104_s29, 1024  ;;  %p1106_p5 = scmp.lt.s32.totalorder %s1324_s9, %s1104_s29 }
  0x43   : > { %p1101_p1 = pnand %p1099_p12, %p1085_p13  ;;  %p1107_p0 = scmp.lt.s32.totalorder %s1105_s8, %s1098_s25 }
  0x45   : > { %p1102_p7 = pneg %p1101_p1  ;;  %p1108_p3 = por %p1107_p0, %p1106_p5 }
  0x47   : > { %p1109_p6 = pnand %p1108_p3, %p1102_p7 }
  0x49   : > { %1112 = shalt.err (!%p1109_p6)
}
  0x4a   : > { %s1202_s16 = smov 128   ;;  %s1203_s18 = smov 8  }
  0x4b   : > { %933 = dma.hbm_to_vmem [thread:$0]  (!%p1328_p10), %s1322_s30, 512, %s1324_s9, %s1333_s15, %s1202_s16, %s1202_s16, %s1203_s18  }
  0x4c   : > { %p285_p8 = scmp.lt.s32.totalorder %s1197_s14, 3  ;;  %p1534_p11 = scmp.ge.s32.totalorder %s1197_s14, 1 }
  0x4e   : > { %p286_p13 = pnand %p1534_p11, %p285_p8 }
  0x4f   : > { %s1365_s20 = sand.u32 (!%p286_p13), 1, %s1181_s10  }
  0x50   : > { %289 = sbr.rel (%p286_p13) target bundleno = 553 (0x229), region = 40  ;;  %s847_s19 = sshll.u32 (!%p286_p13), %s1365_s20, 5 }
  0x51   : > { %s292_s26 = scalar_lea.sflag (!%p286_p13), [#allocation6], %s1365_s20  ;;  %s1369_s27 = scalar_lea.vmem (!%p286_p13), [#allocation5], %s847_s19 }
  0x57   : > { %1168 = dma.done.wait (%p1300_p4), %s292_s26, 512  }
  0x58   : > { %1170 = vsyncadd (%p1300_p4), %s292_s26, 4294966784  ;;  %s1376_s30 = sshll.u32 %s1189_s12, 7  ;;  %s848_s9 = sshll.u32 %s1365_s20, 3 }
  0x59   : > { %s369_s0 = sld [smem:[#allocation3 + %s1376_s30]]  ;;  %p342_p5 = scmp.lt.s32.totalorder %s1189_s12, 1 }
  0x5a   : > { %s378_s15 = sld [smem:[#allocation4 + %s1376_s30]]  ;;  %s1402_s13 = scalar_lea.vmem [#allocation8], %s848_s9 }
  0x5b   : > { %s1547_s12 = smov (!%p342_p5, %s1189_s12), 1 }
  0x5c   : > { %s849_s25 = sshll.u32 %s1547_s12, 3  ;;  %s354_s29 = scalar_lea.vmem %s1518_s5, %s1547_s12 }
  0x5d   : > { %s348_s18 = scalar_lea.vmem %s1517_s4, %s849_s25  ;;  %s1396_s3 = scalar_lea.vmem %s1519_s6, %s849_s25 }
  0x5f   : > { %p370_p4 = scmp.ne.s32.totalorder %s369_s0, 0 }
  0x60   : > { %p379_p7 = scmp.ne.s32.totalorder %s378_s15, 0 }
  0x62   : > { %p1398_p10 = pnand %p379_p7, %p370_p4 }
  0x63   : > { %v392_v0 = vlaneseq (!%p1398_p10)  ;;  %v391_v2 = vld [vmem:[%s348_s18] sm:$0xff] (!%p1398_p10)  ;;  %v390_v19 = vld [vmem:[%s1515_s2 + $0x8] sm:$0xff] (!%p1398_p10)  ;;  %v1204_v21 = vmov (!%p1398_p10), 0   ;;  %v1411_v22 = vld [vmem:[%s1369_s27] sm:$0xff] (!%p1398_p10) }
  0x64   : > { %383 = sbr.rel (%p1398_p10) target bundleno = 521 (0x209), region = 48  ;;  %678 = vmatprep.mubr.f32.mxu0 (!%p1398_p10), %v390_v19  ;;  %v684_v20 = vld [vmem:[%s1396_s3] sm:$0xff] (!%p1398_p10)  ;;  %994 = vset.pattern.permute.xlu0 (!%p1398_p10), %v1204_v21  ;;  %v1421_v32 = vld [vmem:[%s1369_s27 + $0x10] sm:$0xff] (!%p1398_p10)  ;;  %v1424_v33 = vld [vmem:[%s1369_s27 + $0x18] sm:$0xff] (!%p1398_p10) }
  0x65   : > { %v393_v1 = vshrl.u32 (!%p1398_p10), %v392_v0, 7  ;;  %v1416_v27 = vld [vmem:[%s1369_s27 + $0x8] sm:$0xff] (!%p1398_p10) }
  0x67   : > { %v470_v3 = vsub.s32 (!%p1398_p10), 4, %v393_v1  ;;  %v394_v4 = vsub.s32 (!%p1398_p10), 0, %v393_v1  ;;  %v489_v7 = vsub.s32 (!%p1398_p10), 5, %v393_v1  ;;  %v413_v9 = vsub.s32 (!%p1398_p10), 1, %v393_v1 }
  0x68   : > { %v508_v11 = vsub.s32 (!%p1398_p10), 6, %v393_v1  ;;  %v432_v13 = vsub.s32 (!%p1398_p10), 2, %v393_v1  ;;  %v527_v15 = vsub.s32 (!%p1398_p10), 7, %v393_v1  ;;  %v451_v17 = vsub.s32 (!%p1398_p10), 3, %v393_v1 }
  0x69   : > { %v471_v5 = vrot.slane (!%p1398_p10), %v391_v2, %v470_v3  ;;  %v395_v6 = vrot.slane (!%p1398_p10), %v391_v2, %v394_v4  ;;  %v490_v8 = vrot.slane (!%p1398_p10), %v391_v2, %v489_v7  ;;  %v414_v10 = vrot.slane (!%p1398_p10), %v391_v2, %v413_v9 }
  0x6a   : > { %v509_v12 = vrot.slane (!%p1398_p10), %v391_v2, %v508_v11  ;;  %v433_v14 = vrot.slane (!%p1398_p10), %v391_v2, %v432_v13  ;;  %v528_v16 = vrot.slane (!%p1398_p10), %v391_v2, %v527_v15  ;;  %v452_v18 = vrot.slane (!%p1398_p10), %v391_v2, %v451_v17 }
  0x6b   : > { %473 = vbcast.lane.b32.xlu0 %v471_v5, 256  ;;  %397 = vbcast.lane.b32.xlu1 %v395_v6, 256 }
  0x6f   : > { %477 = vbcast.lane.b32.xlu0 %v471_v5, 264  ;;  %401 = vbcast.lane.b32.xlu1 %v395_v6, 264 }
  0x73   : > { %481 = vbcast.lane.b32.xlu0 %v471_v5, 272  ;;  %485 = vbcast.lane.b32.xlu1 %v471_v5, 280 }
  0x77   : > { %405 = vbcast.lane.b32.xlu0 %v395_v6, 272  ;;  %409 = vbcast.lane.b32.xlu1 %v395_v6, 280 }
  0x7b   : > { %492 = vbcast.lane.b32.xlu0 %v490_v8, 256  ;;  %496 = vbcast.lane.b32.xlu1 %v490_v8, 264 }
  0x7f   : > { %416 = vbcast.lane.b32.xlu0 %v414_v10, 256  ;;  %420 = vbcast.lane.b32.xlu1 %v414_v10, 264 }
  0x83   : > { %500 = vbcast.lane.b32.xlu0 %v490_v8, 272  ;;  %504 = vbcast.lane.b32.xlu1 %v490_v8, 280 }
  0x87   : > { %424 = vbcast.lane.b32.xlu0 %v414_v10, 272  ;;  %428 = vbcast.lane.b32.xlu1 %v414_v10, 280 }
  0x8b   : > { %511 = vbcast.lane.b32.xlu0 %v509_v12, 256  ;;  %515 = vbcast.lane.b32.xlu1 %v509_v12, 264 }
  0x8f   : > { %435 = vbcast.lane.b32.xlu0 %v433_v14, 256  ;;  %439 = vbcast.lane.b32.xlu1 %v433_v14, 264 }
  0x93   : > { %519 = vbcast.lane.b32.xlu0 %v509_v12, 272  ;;  %523 = vbcast.lane.b32.xlu1 %v509_v12, 280 }
  0x97   : > { %443 = vbcast.lane.b32.xlu0 %v433_v14, 272  ;;  %447 = vbcast.lane.b32.xlu1 %v433_v14, 280 }
  0x9b   : > { %530 = vbcast.lane.b32.xlu0 %v528_v16, 256  ;;  %534 = vbcast.lane.b32.xlu1 %v528_v16, 264 }
  0x9f   : > { %454 = vbcast.lane.b32.xlu0 %v452_v18, 256  ;;  %458 = vbcast.lane.b32.xlu1 %v452_v18, 264 }
  0xa3   : > { %538 = vbcast.lane.b32.xlu0 %v528_v16, 272  ;;  %542 = vbcast.lane.b32.xlu1 %v528_v16, 280 }
  0xa7   : > { %462 = vbcast.lane.b32.xlu0 %v452_v18, 272  ;;  %466 = vbcast.lane.b32.xlu1 %v452_v18, 280 }
  0xab   : > { %687 = vperm.xlu0 %994, %v684_v20  }
  0xdd   : > { %v474_v23 = vpop.permute.xlu0 %473  ;;  %v398_v24 = vpop.permute.xlu1 %397 }
  0xde   : > { %v560_v25 = vadd.f32 %v474_v23, %v1411_v22  ;;  %v544_v26 = vadd.f32 %v398_v24, %v1411_v22 }
  0xe0   : > { %995 = vtanh.f32 %v560_v25 }
  0xe1   : > { %v478_v28 = vpop.permute.xlu0 %477  ;;  %v402_v29 = vpop.permute.xlu1 %401  ;;  %997 = vtanh.f32 %v544_v26 }
  0xe2   : > { %v561_v30 = vadd.f32 %v478_v28, %v1416_v27  ;;  %v545_v31 = vadd.f32 %v402_v29, %v1416_v27 }
  0xe4   : > { %999 = vtanh.f32 %v561_v30 }
  0xe5   : > { %1001 = vtanh.f32 %v545_v31  ;;  %v482_v34 = vpop.permute.xlu0 %481  ;;  %v486_v35 = vpop.permute.xlu1 %485 }
  0xe6   : > { %v562_v36 = vadd.f32 %v482_v34, %v1421_v32  ;;  %v563_v37 = vadd.f32 %v486_v35, %v1424_v33 }
  0xe8   : > { %1003 = vtanh.f32 %v562_v36 }
  0xe9   : > { %1005 = vtanh.f32 %v563_v37  ;;  %v406_v38 = vpop.permute.xlu0 %405  ;;  %v410_v39 = vpop.permute.xlu1 %409 }
  0xea   : > { %v546_v40 = vadd.f32 %v406_v38, %v1421_v32  ;;  %v547_v41 = vadd.f32 %v410_v39, %v1424_v33  ;;  %v996_v42 = vpop.eup %995 }
  0xeb   : > { %v998_v43 = vpop.eup %997 }
  0xec   : > { %1007 = vtanh.f32 %v546_v40 }
  0xed   : > { %1009 = vtanh.f32 %v547_v41  ;;  %v493_v44 = vpop.permute.xlu0 %492  ;;  %v497_v45 = vpop.permute.xlu1 %496 }
  0xee   : > { %v1000_v46 = vpop.eup %999  ;;  %v564_v47 = vadd.f32 %v493_v44, %v1411_v22  ;;  %v565_v48 = vadd.f32 %v497_v45, %v1416_v27 }
  0xef   : > { %v1002_v49 = vpop.eup %1001  ;;  %v894_v50 = vpack.c.bf16 %v1000_v46, %v996_v42 }
  0xf0   : > { %1011 = vtanh.f32 %v564_v47  ;;  %v896_v51 = vpack.c.bf16 %v1002_v49, %v998_v43 }
  0xf1   : > { %1013 = vtanh.f32 %v565_v48  ;;  %v417_v52 = vpop.permute.xlu0 %416  ;;  %v421_v53 = vpop.permute.xlu1 %420  ;;  %895 = vmatprep.subr.bf16.mxu0 %v894_v50 }
  0xf2   : > { %v1004_v54 = vpop.eup %1003  ;;  %v548_v55 = vadd.f32 %v417_v52, %v1411_v22  ;;  %v549_v56 = vadd.f32 %v421_v53, %v1416_v27  ;;  %897 = vmatpush3.bf16.msra.mxu0 %v896_v51 }
  0xf3   : > { %v1006_v57 = vpop.eup %1005 }
  0xf4   : > { %1015 = vtanh.f32 %v548_v55  ;;  %v898_v58 = vpack.c.bf16 %v1006_v57, %v1004_v54 }
  0xf5   : > { %1017 = vtanh.f32 %v549_v56  ;;  %v501_v59 = vpop.permute.xlu0 %500  ;;  %v505_v60 = vpop.permute.xlu1 %504 }
  0xf6   : > { %v1008_v61 = vpop.eup %1007  ;;  %v566_v62 = vadd.f32 %v501_v59, %v1421_v32  ;;  %v567_v63 = vadd.f32 %v505_v60, %v1424_v33  ;;  %899 = vmatprep.subr.bf16.mxu0 %v898_v58 }
  0xf7   : > { %v1010_v0 = vpop.eup %1009 }
  0xf8   : > { %1019 = vtanh.f32 %v566_v62  ;;  %v900_v1 = vpack.c.bf16 %v1010_v0, %v1008_v61 }
  0xf9   : > { %1021 = vtanh.f32 %v567_v63  ;;  %v425_v2 = vpop.permute.xlu0 %424  ;;  %v429_v3 = vpop.permute.xlu1 %428 }
  0xfa   : > { %v1012_v4 = vpop.eup %1011  ;;  %v550_v5 = vadd.f32 %v425_v2, %v1421_v32  ;;  %v551_v6 = vadd.f32 %v429_v3, %v1424_v33  ;;  %901 = vmatpush3.bf16.msra.mxu0 %v900_v1 }
  0xfb   : > { %v1014_v7 = vpop.eup %1013 }
  0xfc   : > { %1023 = vtanh.f32 %v550_v5  ;;  %v902_v8 = vpack.c.bf16 %v1014_v7, %v1012_v4 }
  0xfd   : > { %1025 = vtanh.f32 %v551_v6  ;;  %v512_v9 = vpop.permute.xlu0 %511  ;;  %v516_v10 = vpop.permute.xlu1 %515 }
  0xfe   : > { %v1016_v11 = vpop.eup %1015  ;;  %v568_v12 = vadd.f32 %v512_v9, %v1411_v22  ;;  %v569_v13 = vadd.f32 %v516_v10, %v1416_v27  ;;  %903 = vmatprep.subr.bf16.mxu0 %v902_v8 }
  0xff   : > { %v1018_v14 = vpop.eup %1017 }
 0x100   : > { %1027 = vtanh.f32 %v568_v12  ;;  %v904_v15 = vpack.c.bf16 %v1018_v14, %v1016_v11 }
 0x101   : > { %1029 = vtanh.f32 %v569_v13  ;;  %v436_v16 = vpop.permute.xlu0 %435  ;;  %v440_v17 = vpop.permute.xlu1 %439  ;;  %v853_v13 = vld [vmem:[%s354_s29] ss:$0 sm:$0xff] }
 0x102   : > { %v1020_v18 = vpop.eup %1019  ;;  %v552_v19 = vadd.f32 %v436_v16, %v1411_v22  ;;  %v553_v20 = vadd.f32 %v440_v17, %v1416_v27  ;;  %905 = vmatpush3.bf16.msra.mxu0 %v904_v15 }
 0x103   : > { %v1022_v21 = vpop.eup %1021 }
 0x104   : > { %1031 = vtanh.f32 %v552_v19  ;;  %v906_v23 = vpack.c.bf16 %v1022_v21, %v1020_v18 }
 0x105   : > { %1033 = vtanh.f32 %v553_v20  ;;  %v520_v24 = vpop.permute.xlu0 %519  ;;  %v524_v25 = vpop.permute.xlu1 %523 }
 0x106   : > { %v1024_v26 = vpop.eup %1023  ;;  %v570_v28 = vadd.f32 %v520_v24, %v1421_v32  ;;  %v571_v29 = vadd.f32 %v524_v25, %v1424_v33  ;;  %907 = vmatprep.subr.bf16.mxu0 %v906_v23 }
 0x107   : > { %v1026_v30 = vpop.eup %1025 }
 0x108   : > { %1035 = vtanh.f32 %v570_v28  ;;  %v908_v31 = vpack.c.bf16 %v1026_v30, %v1024_v26 }
 0x109   : > { %1037 = vtanh.f32 %v571_v29  ;;  %v444_v34 = vpop.permute.xlu0 %443  ;;  %v448_v35 = vpop.permute.xlu1 %447 }
 0x10a   : > { %v1028_v36 = vpop.eup %1027  ;;  %v554_v37 = vadd.f32 %v444_v34, %v1421_v32  ;;  %v555_v38 = vadd.f32 %v448_v35, %v1424_v33  ;;  %909 = vmatpush3.bf16.msra.mxu0 %v908_v31 }
 0x10b   : > { %v1030_v39 = vpop.eup %1029 }
 0x10c   : > { %1039 = vtanh.f32 %v554_v37  ;;  %v910_v40 = vpack.c.bf16 %v1030_v39, %v1028_v36 }
 0x10d   : > { %1041 = vtanh.f32 %v555_v38  ;;  %v531_v41 = vpop.permute.xlu0 %530  ;;  %v535_v42 = vpop.permute.xlu1 %534 }
 0x10e   : > { %v1032_v43 = vpop.eup %1031  ;;  %v572_v44 = vadd.f32 %v531_v41, %v1411_v22  ;;  %v573_v45 = vadd.f32 %v535_v42, %v1416_v27  ;;  %911 = vmatprep.subr.bf16.mxu0 %v910_v40 }
 0x10f   : > { %v1034_v46 = vpop.eup %1033 }
 0x110   : > { %1043 = vtanh.f32 %v572_v44  ;;  %v912_v47 = vpack.c.bf16 %v1034_v46, %v1032_v43 }
 0x111   : > { %1045 = vtanh.f32 %v573_v45  ;;  %v455_v48 = vpop.permute.xlu0 %454  ;;  %v459_v49 = vpop.permute.xlu1 %458 }
 0x112   : > { %v1036_v50 = vpop.eup %1035  ;;  %v556_v51 = vadd.f32 %v455_v48, %v1411_v22  ;;  %v557_v52 = vadd.f32 %v459_v49, %v1416_v27  ;;  %913 = vmatpush3.bf16.msra.mxu0 %v912_v47 }
 0x113   : > { %v1038_v53 = vpop.eup %1037 }
 0x114   : > { %1047 = vtanh.f32 %v556_v51  ;;  %v914_v54 = vpack.c.bf16 %v1038_v53, %v1036_v50 }
 0x115   : > { %1049 = vtanh.f32 %v557_v52  ;;  %v539_v55 = vpop.permute.xlu0 %538  ;;  %v543_v56 = vpop.permute.xlu1 %542 }
 0x116   : > { %v1040_v57 = vpop.eup %1039  ;;  %v574_v58 = vadd.f32 %v539_v55, %v1421_v32  ;;  %v575_v59 = vadd.f32 %v543_v56, %v1424_v33  ;;  %915 = vmatprep.subr.bf16.mxu0 %v914_v54 }
 0x117   : > { %v1042_v60 = vpop.eup %1041 }
 0x118   : > { %1051 = vtanh.f32 %v574_v58  ;;  %v916_v61 = vpack.c.bf16 %v1042_v60, %v1040_v57 }
 0x119   : > { %1053 = vtanh.f32 %v575_v59  ;;  %v463_v22 = vpop.permute.xlu0 %462  ;;  %v467_v62 = vpop.permute.xlu1 %466 }
 0x11a   : > { %v1044_v27 = vpop.eup %1043  ;;  %v558_v63 = vadd.f32 %v463_v22, %v1421_v32  ;;  %v559_v0 = vadd.f32 %v467_v62, %v1424_v33  ;;  %917 = vmatpush3.bf16.msra.mxu0 %v916_v61  ;;  %v389_v33 = vld [vmem:[%s1515_s2] sm:$0xff] }
 0x11b   : > { %v1046_v1 = vpop.eup %1045 }
 0x11c   : > { %1055 = vtanh.f32 %v558_v63  ;;  %v918_v2 = vpack.c.bf16 %v1046_v1, %v1044_v27 }
 0x11d   : > { %1057 = vtanh.f32 %v559_v0 }
 0x11e   : > { %v1048_v3 = vpop.eup %1047  ;;  %919 = vmatprep.subr.bf16.mxu0 %v918_v2 }
 0x11f   : > { %v1050_v4 = vpop.eup %1049 }
 0x120   : > { %v920_v5 = vpack.c.bf16 %v1050_v4, %v1048_v3 }
 0x122   : > { %v1052_v6 = vpop.eup %1051  ;;  %921 = vmatpush3.bf16.msra.mxu0 %v920_v5 }
 0x123   : > { %v1054_v7 = vpop.eup %1053 }
 0x124   : > { %v922_v8 = vpack.c.bf16 %v1054_v7, %v1052_v6 }
 0x126   : > { %v1056_v9 = vpop.eup %1055  ;;  %923 = vmatprep.subr.bf16.mxu0 %v922_v8 }
 0x127   : > { %v1058_v32 = vpop.eup %1057 }
 0x128   : > { %v924_v10 = vpack.c.bf16 %v1058_v32, %v1056_v9 }
 0x12a   : > { %925 = vmatpush3.bf16.msra.mxu0 %v924_v10  ;;  %v688_v15 = vpop.permute.xlu0 %687 }
 0x12d   : > { %679 = vmatmul.mubr.f32.vlgmr.msra.gmra.mrb[0].mxu0 %v389_v33 }
 0x200   : > { %v891_v11 = vpop.f32.mrb[0].mxu0 }
 0x201   : > { %v892_v12 = vpop.f32.mrb[1].mxu0 }
 0x202   : > { %v893_v14 = vadd.f32 %v892_v12, %v891_v11 }
 0x204   : > { %v681_v16 = vadd.f32 %v893_v14, %v853_v13 }
 0x206   : > { %v690_v17 = vadd.f32 %v688_v15, %v681_v16 }
 0x208   : > { %691 = vst [vmem:[%s1402_s13] sm:$0xff] %v690_v17 }
 0x209 PF: > { %694 = sbr.rel (!%p1398_p10) target bundleno = 528 (0x210), region = 52  ;;  %v1205_v18 = vmov (%p1398_p10), -inf  }
 0x20a   : > { %695 = vst [vmem:[%s1402_s13] sm:$0xff] (%p1398_p10), %v1205_v18 }
 0x210 PF: > { %s1470_s12 = scalar_lea.hbm %s1520_s7, %s1376_s30  ;;  %s712_s29 = sshll.u32 %s1402_s13, 4  ;;  %s713_s29 = int_to_ptr.vmem [resolvable:$true] %s712_s29 }
 0x211   : > { %s697_s8 = scalar_lea.sflag [#allocation7], %s1365_s20  ;;  %s1113_s16 = scalar_lea.vmem %s713_s29, 128 }
 0x212   : > { %p1114_p2 = scmp.ne.s32.totalorder %s713_s29, %s1113_s16  ;;  %p1536_p9 = scmp.ne.s32.totalorder %s1530_s22, 0 }
 0x213   : > { %s1206_s17 = smov [#allocation8]  }
 0x214   : > { %p1115_p12 = pnand %p1114_p2, %p1536_p9  ;;  %s1117_s18 = sshll.u32 %s1206_s17, 4  ;;  %s1118_s18 = int_to_ptr.vmem [resolvable:$false] %s1117_s18 }
 0x215   : > { %s1119_s19 = scalar_lea.vmem %s1118_s18, 256  ;;  %p1120_p0 = scmp.lt.s32.totalorder %s713_s29, %s1118_s18 }
 0x216   : > { %p1116_p1 = pneg %p1115_p12  ;;  %p1121_p3 = scmp.lt.s32.totalorder %s1119_s19, %s1113_s16 }
 0x218   : > { %p1122_p6 = por %p1121_p3, %p1120_p0 }
 0x21a   : > { %p1123_p8 = pnand %p1122_p6, %p1116_p1 }
 0x21c   : > { %1126 = shalt.err (!%p1123_p8)
}
 0x21d   : > { %s1127_s13 = scalar_lea.hbm %s1470_s12, 128  ;;  %s1131_s26 = scalar_lea.hbm %s1520_s7, 256 }
 0x21e   : > { %p1128_p11 = scmp.ne.s32.totalorder %s1470_s12, %s1127_s13  ;;  %p1132_p4 = scmp.lt.u32.totalorder %s1470_s12, %s1520_s7 }
 0x21f   : > { %p1133_p7 = scmp.lt.u32.totalorder %s1131_s26, %s1127_s13  ;;  %p1135_p2 = scmp.lt.u32.totalorder %s1127_s13, %s1470_s12 }
 0x220   : > { %p1129_p13 = pnand %p1128_p11, %p1536_p9 }
 0x221   : > { %p1134_p10 = por %p1133_p7, %p1132_p4 }
 0x222   : > { %p1130_p5 = pneg %p1129_p13 }
 0x223   : > { %p1136_p12 = por %p1135_p2, %p1134_p10 }
 0x225   : > { %p1137_p1 = pnand %p1136_p12, %p1130_p5 }
 0x227   : > { %1140 = shalt.err (!%p1137_p1)
}
 0x228   : > { %928 = dma.vmem_to_hbm [thread:$0]  (%p1536_p9), %s713_s29, 128, %s1470_s12, %s697_s8  }
 0x229 PF: > { %s724_s3 = sand.u32 1, %s1177_s1   ;;  %p1537_p0 = scmp.ne.s32.totalorder %s1531_s24, 0 }
 0x22a   : > { %p1538_p3 = scmp.ge.s32.totalorder %s1197_s14, 2  ;;  %s725_s27 = scalar_lea.sflag [#allocation7], %s724_s3 }
 0x22c   : > { %p935_p6 = pnand %p1538_p3, %p1537_p0 }
 0x22e   : > { %1172 = dma.done.wait (!%p935_p6), %s725_s27, 128  }
 0x22f   : > { %1174 = vsyncadd (!%p935_p6), %s725_s27, 4294967168  ;;  %s33_s14 = sadd.s32 1, %s1197_s14   ;;  %s1539_s12 = sld [smem:[#allocation12_spill]] }
 0x230   : > { %p30_p8 = scmp.ge.s32.totalorder %s33_s14, 4   ;;  %s1540_s13 = sld [smem:[#allocation13_spill]] }
 0x231   : > { %s1541_s1 = smov %s1181_s10  ;;  %s1542_s10 = smov %s1185_s11 }
 0x232   : > { %s1543_s11 = smov %s1309_s23  ;;  %32 = sbr.rel (!%p30_p8) target bundleno = 32 (0x20), region = 102 }
 0x239   :  { %730 = vsyncpa [#allocation6], 1 }
 0x23a   :  { %732 = vsyncpa [#allocation6 + $0x1], 1 }
 0x23b   :  { %733 = vsyncpa [#allocation7], 1 }
 0x23c   :  { %735 = vsyncpa [#allocation7 + $0x1], 1 }

</bundles_post_ra>
